<compile_context>
chip_gen: v5e
topology: v5e:2x2
jax: 0.10.0
libtpu: 0.0.40
codegen_flags: <defaults>
</compile_context>

<pallas_src>
import functools

import numpy as np
import jax
import jax.numpy as jnp
from jax.experimental import pallas as pl
from jax.experimental.pallas import tpu as pltpu


# ----------------------------------------------------------------------------
# AdaptiveAvgPool2d(k) bin matrix (exact PyTorch bin semantics:
# start = floor(i*in/out), end = ceil((i+1)*in/out)).
# ----------------------------------------------------------------------------
def _adaptive_pool_matrix(in_size, out_size):
    P = np.zeros((out_size, in_size), dtype=np.float32)
    for i in range(out_size):
        start = (i * in_size) // out_size
        end = -((-(i + 1) * in_size) // out_size)  # ceil((i+1)*in/out)
        P[i, start:end] = 1.0 / (end - start)
    return P


def _pool_kron_T(H, W, k):
    """(H*W, k*k) matrix Pt such that pooled = x_flat @ Pt for x_flat (C, H*W).

    Every column of Pt sums to 1 (average pooling) -> conv(pool(x)) == conv(x) @ Pt.
    """
    ph = _adaptive_pool_matrix(H, k)  # (k, H)
    pw = _adaptive_pool_matrix(W, k)  # (k, W)
    pt = np.einsum("ih,jw->hwij", ph, pw).reshape(H * W, k * k)
    return jnp.asarray(pt, jnp.float32)


def _oob_mask(H, W, k):
    """(k*k, H*W) f32 masks: 1 where the source pixel of tap t is in-bounds."""
    p = (k - 1) // 2
    q = np.arange(H * W)
    i, j = q // W, q % W
    m = np.zeros((k * k, H * W), dtype=np.float32)
    for di in range(k):
        for dj in range(k):
            si, sj = di - p, dj - p
            ok = (i + si >= 0) & (i + si < H) & (j + sj >= 0) & (j + sj < W)
            m[di * k + dj] = ok.astype(np.float32)
    return jnp.asarray(m)


# ----------------------------------------------------------------------------
# Fused RAM kernel: one grid step == B batch samples.
# ----------------------------------------------------------------------------
def _ram_kernel(x_ref, wc_ref, bc_ref, pt_ref, mask_ref, wf_ref, bf_ref, o_ref,
                *, W, k, B):
    kk = k * k
    p = (k - 1) // 2
    center = kk // 2  # odd k: centre tap (no shift, no mask)

    wc = wc_ref[...]            # (C/4, C)   bf16
    pt = pt_ref[...]            # (H*W, k*k) bf16
    wf = wf_ref[...]            # (C, C/4)   bf16

    for b in range(B):
        x = x_ref[b]            # (C, H*W)   bf16, lane-dense
        HW = x.shape[1]

        # f branch: 1x1 conv (bf16 MXU, f32 accumulation), lane-dense result.
        f = (jnp.dot(wc, x, preferred_element_type=jnp.float32)
             + bc_ref[...])                                        # (C/4, HW) f32

        # g branch: g = f @ Pt  (exact because Pt's columns sum to 1).
        g = jnp.dot(f.astype(jnp.bfloat16), pt,
                    preferred_element_type=jnp.float32)            # (C/4, k*k) f32

        # Hoist the per-tap lane slices out of the unrolled tap loop.
        taps = [g[:, t:t + 1] for t in range(kk)]                  # each (C/4, 1)

        # Dynamic depthwise conv on the flattened spatial axis.
        # dw_bias is folded into b_fuse on the host -> init with the centre tap.
        acc = taps[center] * f
        for di in range(k):
            for dj in range(k):
                t = di * k + dj
                if t == center:
                    continue
                off = (di - p) * W + (dj - p)
                # contrib[q] = f[q + off] where the source pixel is in-bounds.
                shifted = pltpu.roll(f, shift=(-off) % HW, axis=1)  # XLU slot
                acc = acc + taps[t] * (shifted * mask_ref[t:t + 1, :])

        # fuse: 1x1 conv back to C channels.  Reduction depth is only C/4
        # (K-underfilled MXU when C/4 < 128) but the HW-wide lane dim keeps
        # weight-stationary reuse high.
        o_ref[b] = (jnp.dot(wf, acc.astype(jnp.bfloat16),
                            preferred_element_type=jnp.float32)
                    + bf_ref[...])


def _pick_batch_block(N, C, HW):
    """Largest divisor of N (<=8) that keeps >=2 grid steps and fits VMEM."""
    budget = 24 * 1024 * 1024          # leave pipeline headroom in scoped VMEM
    best = 1
    for b in range(1, min(N, 8) + 1):
        if N % b:
            continue
        if N // b < 2 and N > 1:       # keep >=2 steps for pipelining / megacore
            continue
        if 2 * b * C * HW * (2 + 4) > budget:   # double-buffered bf16 in + f32 out
            continue
        best = b
    return best


# ----------------------------------------------------------------------------
# Wrapper: one pallas_call for the whole forward.  No NCHW transposes —
# (N, C, H, W) <-> (N, C, H*W) are free reshapes.
# ----------------------------------------------------------------------------
def ram_forward(x, params, k, batch_block=None):
    N, C, H, W = x.shape
    assert C % 4 == 0 and k % 2 == 1
    C4 = C // 4
    HW = H * W
    kk = k * k

    B = batch_block if batch_block is not None else _pick_batch_block(N, C, HW)
    assert N % B == 0

    # bf16 MXU operands (in a real pipeline the producer already emits bf16).
    x_flat = x.reshape(N, C, HW).astype(jnp.bfloat16)
    w_conv = params["w_conv"].astype(jnp.bfloat16)
    w_fuse = params["w_fuse"].astype(jnp.bfloat16)
    b_conv = params["b_conv"].reshape(C4, 1)
    # Fold the depthwise bias into the fuse bias (exact: bias is per-channel,
    # constant over pixels, and fuse is affine).
    b_fuse_eff = (params["b_fuse"] + params["w_fuse"] @ params["dw_bias"]).reshape(C, 1)
    pt = _pool_kron_T(H, W, k).astype(jnp.bfloat16)
    mask = _oob_mask(H, W, k)

    # Rough per-step VMEM: double-buffered x/out blocks + constants (lane-padded).
    pad128 = lambda n: ((n + 127) // 128) * 128
    blk_bytes = 2 * (B * C * HW * 2 + B * C * HW * 4)
    cst_bytes = (C4 * pad128(C) * 2 + C4 * 128 * 4 + HW * pad128(kk) * 2 +
                 kk * pad128(HW) * 4 + C * pad128(C4) * 2 + C * 128 * 4)
    vmem_limit = int(min(64 * 1024 * 1024,                    # v7x physical VMEM
                         max(32 * 1024 * 1024, 4 * (blk_bytes + cst_bytes))))

    kernel = functools.partial(_ram_kernel, W=W, k=k, B=B)
    out = pl.pallas_call(
        kernel,
        out_shape=jax.ShapeDtypeStruct((N, C, HW), jnp.float32),
        grid=(N // B,),
        in_specs=[
            pl.BlockSpec((B, C, HW), lambda n: (n, 0, 0)),   # x, B samples/step
            pl.BlockSpec((C4, C), lambda n: (0, 0)),         # w_conv (bf16)
            pl.BlockSpec((C4, 1), lambda n: (0, 0)),         # b_conv (f32)
            pl.BlockSpec((HW, kk), lambda n: (0, 0)),        # pooling matrix Pt
            pl.BlockSpec((kk, HW), lambda n: (0, 0)),        # OOB tap masks
            pl.BlockSpec((C, C4), lambda n: (0, 0)),         # w_fuse (bf16)
            pl.BlockSpec((C, 1), lambda n: (0, 0)),          # b_fuse + w_fuse@dw_bias
        ],
        out_specs=pl.BlockSpec((B, C, HW), lambda n: (n, 0, 0)),
        compiler_params=pltpu.CompilerParams(
            dimension_semantics=("parallel",),               # v7x: 2 TCs split batch
            vmem_limit_bytes=vmem_limit,
        ),
    )(x_flat, w_conv, b_conv, pt, mask, w_fuse, b_fuse_eff)
    return out.reshape(N, C, H, W)


def init_params(key, channel, k):
    c4 = channel // 4
    ks = jax.random.split(key, 5)
    s_conv = 1.0 / np.sqrt(channel)
    s_fuse = 1.0 / np.sqrt(c4)
    s_dw = 1.0 / np.sqrt(k * k)
    return {
        "w_conv": jax.random.uniform(ks[0], (c4, channel), jnp.float32, -s_conv, s_conv),
        "b_conv": jax.random.uniform(ks[1], (c4,), jnp.float32, -s_conv, s_conv),
        "w_fuse": jax.random.uniform(ks[2], (channel, c4), jnp.float32, -s_fuse, s_fuse),
        "b_fuse": jax.random.uniform(ks[3], (channel,), jnp.float32, -s_fuse, s_fuse),
        "dw_bias": jax.random.uniform(ks[4], (c4,), jnp.float32, -s_dw, s_dw),
    }


# ----------------------------------------------------------------------------
# Pure-JAX reference (numerical sanity check only, all f32).
# ----------------------------------------------------------------------------
def ram_reference(x, params, k):
    N, C, H, W = x.shape
    conv = lambda z, w, b: jnp.einsum("nchw,oc->nohw", z, w) + b[None, :, None, None]
    f = conv(x, params["w_conv"], params["b_conv"])
    ph = jnp.asarray(_adaptive_pool_matrix(H, k))
    pw = jnp.asarray(_adaptive_pool_matrix(W, k))
    pooled = jnp.einsum("nchw,ih,jw->ncij", x, ph, pw)
    g = conv(pooled, params["w_conv"], params["b_conv"])
    pad = (k - 1) // 2
    h_out = H + 2 * pad - k + 1
    w_out = W + 2 * pad - k + 1
    fpad = jnp.pad(f, ((0, 0), (0, 0), (pad, pad), (pad, pad)))
    o = jnp.zeros((N, C // 4, h_out, w_out), jnp.float32)
    for di in range(k):
        for dj in range(k):
            o = o + g[:, :, di, dj][:, :, None, None] * fpad[:, :, di:di + h_out, dj:dj + w_out]
    o = o + params["dw_bias"][None, :, None, None]
    return conv(o, params["w_fuse"], params["b_fuse"])


if __name__ == "__main__":
    key = jax.random.PRNGKey(0)
    k_x, k_p = jax.random.split(key)
    N, C, H, W = 4, 16, 16, 16   # channel must be divisible by 4
    k = 3                        # depthwise kernel size (odd -> same-size output)
    x = jax.random.normal(k_x, (N, C, H, W), jnp.float32)
    params = init_params(k_p, C, k)

    fwd = jax.jit(ram_forward, static_argnums=2)
    y = jax.block_until_ready(fwd(x, params, k))
    assert y.shape == (N, C, H, W) and y.dtype == jnp.float32

    # Compare against the f32 reference evaluated on the same bf16-quantized
    # operands the kernel's MXU sees (remaining delta: bf16 rounding of f/acc/Pt).
    xq = x.astype(jnp.bfloat16).astype(jnp.float32)
    pq = dict(params)
    pq["w_conv"] = params["w_conv"].astype(jnp.bfloat16).astype(jnp.float32)
    pq["w_fuse"] = params["w_fuse"].astype(jnp.bfloat16).astype(jnp.float32)
    y_ref = ram_reference(xq, pq, k)
    max_err = float(jnp.max(jnp.abs(y - y_ref)))
    assert np.allclose(np.asarray(y), np.asarray(y_ref), atol=2e-2, rtol=2e-2), (
        "mismatch vs reference: max abs err = %g" % max_err)
    print("KERNEL_OK")
</pallas_src>

<mosaic_0001>
module attributes {stable_mosaic.version = 11 : i64} {
  func.func @_ram_kernel(%arg0: i32, %arg1: memref<2x16x256xbf16, #tpu.memory_space<vmem>>, %arg2: memref<4x16xbf16, #tpu.memory_space<vmem>>, %arg3: memref<4x1xf32, #tpu.memory_space<vmem>>, %arg4: memref<256x9xbf16, #tpu.memory_space<vmem>>, %arg5: memref<9x256xf32, #tpu.memory_space<vmem>>, %arg6: memref<16x4xbf16, #tpu.memory_space<vmem>>, %arg7: memref<16x1xf32, #tpu.memory_space<vmem>>, %arg8: memref<2x16x256xf32, #tpu.memory_space<vmem>>) attributes {dimension_semantics = [#tpu.dimension_semantics<parallel>], iteration_bounds = array<i64: 2>, scalar_prefetch = 0 : i64, scratch_operands = 0 : i64, tpu.core_type = #tpu.core_type<tc>, window_params = [{transform_indices = @transform_0, window_bounds = array<i64: 2, 16, 256>}, {pipeline_mode = #tpu.pipeline_mode<synchronous>, transform_indices = @transform_1, window_bounds = array<i64: 4, 16>}, {pipeline_mode = #tpu.pipeline_mode<synchronous>, transform_indices = @transform_2, window_bounds = array<i64: 4, 1>}, {pipeline_mode = #tpu.pipeline_mode<synchronous>, transform_indices = @transform_3, window_bounds = array<i64: 256, 9>}, {pipeline_mode = #tpu.pipeline_mode<synchronous>, transform_indices = @transform_4, window_bounds = array<i64: 9, 256>}, {pipeline_mode = #tpu.pipeline_mode<synchronous>, transform_indices = @transform_5, window_bounds = array<i64: 16, 4>}, {pipeline_mode = #tpu.pipeline_mode<synchronous>, transform_indices = @transform_6, window_bounds = array<i64: 16, 1>}, {transform_indices = @transform_7, window_bounds = array<i64: 2, 16, 256>}]} {
    %c0 = arith.constant 0 : index
    %c0_0 = arith.constant 0 : index
    %0 = vector.load %arg2[%c0, %c0_0] : memref<4x16xbf16, #tpu.memory_space<vmem>>, vector<4x16xbf16>
    %c0_1 = arith.constant 0 : index
    %c0_2 = arith.constant 0 : index
    %1 = vector.load %arg4[%c0_1, %c0_2] : memref<256x9xbf16, #tpu.memory_space<vmem>>, vector<256x9xbf16>
    %c0_3 = arith.constant 0 : index
    %c0_4 = arith.constant 0 : index
    %2 = vector.load %arg6[%c0_3, %c0_4] : memref<16x4xbf16, #tpu.memory_space<vmem>>, vector<16x4xbf16>
    %c0_5 = arith.constant 0 : index
    %c0_6 = arith.constant 0 : index
    %c0_7 = arith.constant 0 : index
    %3 = vector.load %arg1[%c0_5, %c0_6, %c0_7] : memref<2x16x256xbf16, #tpu.memory_space<vmem>>, vector<1x16x256xbf16>
    %4 = vector.shape_cast %3 : vector<1x16x256xbf16> to vector<16x256xbf16>
    %cst = arith.constant dense<0.000000e+00> : vector<4x256xf32>
    %5 = tpu.matmul %0, %4, %cst {dimension_numbers = #tpu.dot_dimension_numbers<[1], [0], [0], [1], [0, 0, 1, 1], [], []>} : vector<4x16xbf16>, vector<16x256xbf16>, vector<4x256xf32> -> vector<4x256xf32>
    %c0_8 = arith.constant 0 : index
    %c0_9 = arith.constant 0 : index
    %6 = vector.load %arg3[%c0_8, %c0_9] : memref<4x1xf32, #tpu.memory_space<vmem>>, vector<4x1xf32>
    %7 = vector.broadcast %6 : vector<4x1xf32> to vector<4x256xf32>
    %8 = arith.addf %5, %7 : vector<4x256xf32>
    %9 = arith.truncf %8 : vector<4x256xf32> to vector<4x256xbf16>
    %cst_10 = arith.constant dense<0.000000e+00> : vector<4x9xf32>
    %10 = tpu.matmul %9, %1, %cst_10 {dimension_numbers = #tpu.dot_dimension_numbers<[1], [0], [0], [1], [0, 0, 1, 1], [], []>} : vector<4x256xbf16>, vector<256x9xbf16>, vector<4x9xf32> -> vector<4x9xf32>
    %11 = vector.extract_strided_slice %10 {offsets = [0, 0], sizes = [4, 1], strides = [1, 1]} : vector<4x9xf32> to vector<4x1xf32>
    %12 = vector.extract_strided_slice %10 {offsets = [0, 1], sizes = [4, 1], strides = [1, 1]} : vector<4x9xf32> to vector<4x1xf32>
    %13 = vector.extract_strided_slice %10 {offsets = [0, 2], sizes = [4, 1], strides = [1, 1]} : vector<4x9xf32> to vector<4x1xf32>
    %14 = vector.extract_strided_slice %10 {offsets = [0, 3], sizes = [4, 1], strides = [1, 1]} : vector<4x9xf32> to vector<4x1xf32>
    %15 = vector.extract_strided_slice %10 {offsets = [0, 4], sizes = [4, 1], strides = [1, 1]} : vector<4x9xf32> to vector<4x1xf32>
    %16 = vector.extract_strided_slice %10 {offsets = [0, 5], sizes = [4, 1], strides = [1, 1]} : vector<4x9xf32> to vector<4x1xf32>
    %17 = vector.extract_strided_slice %10 {offsets = [0, 6], sizes = [4, 1], strides = [1, 1]} : vector<4x9xf32> to vector<4x1xf32>
    %18 = vector.extract_strided_slice %10 {offsets = [0, 7], sizes = [4, 1], strides = [1, 1]} : vector<4x9xf32> to vector<4x1xf32>
    %19 = vector.extract_strided_slice %10 {offsets = [0, 8], sizes = [4, 1], strides = [1, 1]} : vector<4x9xf32> to vector<4x1xf32>
    %20 = vector.broadcast %15 : vector<4x1xf32> to vector<4x256xf32>
    %21 = arith.mulf %20, %8 : vector<4x256xf32>
    %c17_i32 = arith.constant 17 : i32
    %22 = tpu.dynamic_rotate %8 by %c17_i32 dim 1 : vector<4x256xf32>, i32 -> vector<4x256xf32>
    %c0_11 = arith.constant 0 : index
    %c0_12 = arith.constant 0 : index
    %23 = vector.load %arg5[%c0_11, %c0_12] : memref<9x256xf32, #tpu.memory_space<vmem>>, vector<1x256xf32>
    %24 = vector.broadcast %23 : vector<1x256xf32> to vector<4x256xf32>
    %25 = arith.mulf %22, %24 : vector<4x256xf32>
    %26 = vector.broadcast %11 : vector<4x1xf32> to vector<4x256xf32>
    %27 = arith.mulf %26, %25 : vector<4x256xf32>
    %28 = arith.addf %21, %27 : vector<4x256xf32>
    %c16_i32 = arith.constant 16 : i32
    %29 = tpu.dynamic_rotate %8 by %c16_i32 dim 1 : vector<4x256xf32>, i32 -> vector<4x256xf32>
    %c1 = arith.constant 1 : index
    %c0_13 = arith.constant 0 : index
    %30 = vector.load %arg5[%c1, %c0_13] : memref<9x256xf32, #tpu.memory_space<vmem>>, vector<1x256xf32>
    %31 = vector.broadcast %30 : vector<1x256xf32> to vector<4x256xf32>
    %32 = arith.mulf %29, %31 : vector<4x256xf32>
    %33 = vector.broadcast %12 : vector<4x1xf32> to vector<4x256xf32>
    %34 = arith.mulf %33, %32 : vector<4x256xf32>
    %35 = arith.addf %28, %34 : vector<4x256xf32>
    %c15_i32 = arith.constant 15 : i32
    %36 = tpu.dynamic_rotate %8 by %c15_i32 dim 1 : vector<4x256xf32>, i32 -> vector<4x256xf32>
    %c2 = arith.constant 2 : index
    %c0_14 = arith.constant 0 : index
    %37 = vector.load %arg5[%c2, %c0_14] : memref<9x256xf32, #tpu.memory_space<vmem>>, vector<1x256xf32>
    %38 = vector.broadcast %37 : vector<1x256xf32> to vector<4x256xf32>
    %39 = arith.mulf %36, %38 : vector<4x256xf32>
    %40 = vector.broadcast %13 : vector<4x1xf32> to vector<4x256xf32>
    %41 = arith.mulf %40, %39 : vector<4x256xf32>
    %42 = arith.addf %35, %41 : vector<4x256xf32>
    %c1_i32 = arith.constant 1 : i32
    %43 = tpu.dynamic_rotate %8 by %c1_i32 dim 1 : vector<4x256xf32>, i32 -> vector<4x256xf32>
    %c3 = arith.constant 3 : index
    %c0_15 = arith.constant 0 : index
    %44 = vector.load %arg5[%c3, %c0_15] : memref<9x256xf32, #tpu.memory_space<vmem>>, vector<1x256xf32>
    %45 = vector.broadcast %44 : vector<1x256xf32> to vector<4x256xf32>
    %46 = arith.mulf %43, %45 : vector<4x256xf32>
    %47 = vector.broadcast %14 : vector<4x1xf32> to vector<4x256xf32>
    %48 = arith.mulf %47, %46 : vector<4x256xf32>
    %49 = arith.addf %42, %48 : vector<4x256xf32>
    %c255_i32 = arith.constant 255 : i32
    %50 = tpu.dynamic_rotate %8 by %c255_i32 dim 1 : vector<4x256xf32>, i32 -> vector<4x256xf32>
    %c5 = arith.constant 5 : index
    %c0_16 = arith.constant 0 : index
    %51 = vector.load %arg5[%c5, %c0_16] : memref<9x256xf32, #tpu.memory_space<vmem>>, vector<1x256xf32>
    %52 = vector.broadcast %51 : vector<1x256xf32> to vector<4x256xf32>
    %53 = arith.mulf %50, %52 : vector<4x256xf32>
    %54 = vector.broadcast %16 : vector<4x1xf32> to vector<4x256xf32>
    %55 = arith.mulf %54, %53 : vector<4x256xf32>
    %56 = arith.addf %49, %55 : vector<4x256xf32>
    %c241_i32 = arith.constant 241 : i32
    %57 = tpu.dynamic_rotate %8 by %c241_i32 dim 1 : vector<4x256xf32>, i32 -> vector<4x256xf32>
    %c6 = arith.constant 6 : index
    %c0_17 = arith.constant 0 : index
    %58 = vector.load %arg5[%c6, %c0_17] : memref<9x256xf32, #tpu.memory_space<vmem>>, vector<1x256xf32>
    %59 = vector.broadcast %58 : vector<1x256xf32> to vector<4x256xf32>
    %60 = arith.mulf %57, %59 : vector<4x256xf32>
    %61 = vector.broadcast %17 : vector<4x1xf32> to vector<4x256xf32>
    %62 = arith.mulf %61, %60 : vector<4x256xf32>
    %63 = arith.addf %56, %62 : vector<4x256xf32>
    %c240_i32 = arith.constant 240 : i32
    %64 = tpu.dynamic_rotate %8 by %c240_i32 dim 1 : vector<4x256xf32>, i32 -> vector<4x256xf32>
    %c7 = arith.constant 7 : index
    %c0_18 = arith.constant 0 : index
    %65 = vector.load %arg5[%c7, %c0_18] : memref<9x256xf32, #tpu.memory_space<vmem>>, vector<1x256xf32>
    %66 = vector.broadcast %65 : vector<1x256xf32> to vector<4x256xf32>
    %67 = arith.mulf %64, %66 : vector<4x256xf32>
    %68 = vector.broadcast %18 : vector<4x1xf32> to vector<4x256xf32>
    %69 = arith.mulf %68, %67 : vector<4x256xf32>
    %70 = arith.addf %63, %69 : vector<4x256xf32>
    %c239_i32 = arith.constant 239 : i32
    %71 = tpu.dynamic_rotate %8 by %c239_i32 dim 1 : vector<4x256xf32>, i32 -> vector<4x256xf32>
    %c8 = arith.constant 8 : index
    %c0_19 = arith.constant 0 : index
    %72 = vector.load %arg5[%c8, %c0_19] : memref<9x256xf32, #tpu.memory_space<vmem>>, vector<1x256xf32>
    %73 = vector.broadcast %72 : vector<1x256xf32> to vector<4x256xf32>
    %74 = arith.mulf %71, %73 : vector<4x256xf32>
    %75 = vector.broadcast %19 : vector<4x1xf32> to vector<4x256xf32>
    %76 = arith.mulf %75, %74 : vector<4x256xf32>
    %77 = arith.addf %70, %76 : vector<4x256xf32>
    %78 = arith.truncf %77 : vector<4x256xf32> to vector<4x256xbf16>
    %cst_20 = arith.constant dense<0.000000e+00> : vector<16x256xf32>
    %79 = tpu.matmul %2, %78, %cst_20 {dimension_numbers = #tpu.dot_dimension_numbers<[1], [0], [0], [1], [0, 0, 1, 1], [], []>} : vector<16x4xbf16>, vector<4x256xbf16>, vector<16x256xf32> -> vector<16x256xf32>
    %c0_21 = arith.constant 0 : index
    %c0_22 = arith.constant 0 : index
    %80 = vector.load %arg7[%c0_21, %c0_22] : memref<16x1xf32, #tpu.memory_space<vmem>>, vector<16x1xf32>
    %81 = vector.broadcast %80 : vector<16x1xf32> to vector<16x256xf32>
    %82 = arith.addf %79, %81 : vector<16x256xf32>
    %c0_23 = arith.constant 0 : index
    %c0_24 = arith.constant 0 : index
    %c0_25 = arith.constant 0 : index
    %83 = vector.load %arg8[%c0_23, %c0_24, %c0_25] : memref<2x16x256xf32, #tpu.memory_space<vmem>>, vector<1x16x256xf32>
    %84 = vector.shape_cast %83 : vector<1x16x256xf32> to vector<16x256xf32>
    %85 = vector.shape_cast %82 : vector<16x256xf32> to vector<1x16x256xf32>
    tpu.vector_store %arg8[%c0_23, %c0_24, %c0_25], %85 {strides = array<i32>} : memref<2x16x256xf32, #tpu.memory_space<vmem>>, vector<1x16x256xf32>,
    %c1_26 = arith.constant 1 : index
    %c0_27 = arith.constant 0 : index
    %c0_28 = arith.constant 0 : index
    %86 = vector.load %arg1[%c1_26, %c0_27, %c0_28] : memref<2x16x256xbf16, #tpu.memory_space<vmem>>, vector<1x16x256xbf16>
    %87 = vector.shape_cast %86 : vector<1x16x256xbf16> to vector<16x256xbf16>
    %cst_29 = arith.constant dense<0.000000e+00> : vector<4x256xf32>
    %88 = tpu.matmul %0, %87, %cst_29 {dimension_numbers = #tpu.dot_dimension_numbers<[1], [0], [0], [1], [0, 0, 1, 1], [], []>} : vector<4x16xbf16>, vector<16x256xbf16>, vector<4x256xf32> -> vector<4x256xf32>
    %c0_30 = arith.constant 0 : index
    %c0_31 = arith.constant 0 : index
    %89 = vector.load %arg3[%c0_30, %c0_31] : memref<4x1xf32, #tpu.memory_space<vmem>>, vector<4x1xf32>
    %90 = vector.broadcast %89 : vector<4x1xf32> to vector<4x256xf32>
    %91 = arith.addf %88, %90 : vector<4x256xf32>
    %92 = arith.truncf %91 : vector<4x256xf32> to vector<4x256xbf16>
    %cst_32 = arith.constant dense<0.000000e+00> : vector<4x9xf32>
    %93 = tpu.matmul %92, %1, %cst_32 {dimension_numbers = #tpu.dot_dimension_numbers<[1], [0], [0], [1], [0, 0, 1, 1], [], []>} : vector<4x256xbf16>, vector<256x9xbf16>, vector<4x9xf32> -> vector<4x9xf32>
    %94 = vector.extract_strided_slice %93 {offsets = [0, 0], sizes = [4, 1], strides = [1, 1]} : vector<4x9xf32> to vector<4x1xf32>
    %95 = vector.extract_strided_slice %93 {offsets = [0, 1], sizes = [4, 1], strides = [1, 1]} : vector<4x9xf32> to vector<4x1xf32>
    %96 = vector.extract_strided_slice %93 {offsets = [0, 2], sizes = [4, 1], strides = [1, 1]} : vector<4x9xf32> to vector<4x1xf32>
    %97 = vector.extract_strided_slice %93 {offsets = [0, 3], sizes = [4, 1], strides = [1, 1]} : vector<4x9xf32> to vector<4x1xf32>
    %98 = vector.extract_strided_slice %93 {offsets = [0, 4], sizes = [4, 1], strides = [1, 1]} : vector<4x9xf32> to vector<4x1xf32>
    %99 = vector.extract_strided_slice %93 {offsets = [0, 5], sizes = [4, 1], strides = [1, 1]} : vector<4x9xf32> to vector<4x1xf32>
    %100 = vector.extract_strided_slice %93 {offsets = [0, 6], sizes = [4, 1], strides = [1, 1]} : vector<4x9xf32> to vector<4x1xf32>
    %101 = vector.extract_strided_slice %93 {offsets = [0, 7], sizes = [4, 1], strides = [1, 1]} : vector<4x9xf32> to vector<4x1xf32>
    %102 = vector.extract_strided_slice %93 {offsets = [0, 8], sizes = [4, 1], strides = [1, 1]} : vector<4x9xf32> to vector<4x1xf32>
    %103 = vector.broadcast %98 : vector<4x1xf32> to vector<4x256xf32>
    %104 = arith.mulf %103, %91 : vector<4x256xf32>
    %c17_i32_33 = arith.constant 17 : i32
    %105 = tpu.dynamic_rotate %91 by %c17_i32_33 dim 1 : vector<4x256xf32>, i32 -> vector<4x256xf32>
    %c0_34 = arith.constant 0 : index
    %c0_35 = arith.constant 0 : index
    %106 = vector.load %arg5[%c0_34, %c0_35] : memref<9x256xf32, #tpu.memory_space<vmem>>, vector<1x256xf32>
    %107 = vector.broadcast %106 : vector<1x256xf32> to vector<4x256xf32>
    %108 = arith.mulf %105, %107 : vector<4x256xf32>
    %109 = vector.broadcast %94 : vector<4x1xf32> to vector<4x256xf32>
    %110 = arith.mulf %109, %108 : vector<4x256xf32>
    %111 = arith.addf %104, %110 : vector<4x256xf32>
    %c16_i32_36 = arith.constant 16 : i32
    %112 = tpu.dynamic_rotate %91 by %c16_i32_36 dim 1 : vector<4x256xf32>, i32 -> vector<4x256xf32>
    %c1_37 = arith.constant 1 : index
    %c0_38 = arith.constant 0 : index
    %113 = vector.load %arg5[%c1_37, %c0_38] : memref<9x256xf32, #tpu.memory_space<vmem>>, vector<1x256xf32>
    %114 = vector.broadcast %113 : vector<1x256xf32> to vector<4x256xf32>
    %115 = arith.mulf %112, %114 : vector<4x256xf32>
    %116 = vector.broadcast %95 : vector<4x1xf32> to vector<4x256xf32>
    %117 = arith.mulf %116, %115 : vector<4x256xf32>
    %118 = arith.addf %111, %117 : vector<4x256xf32>
    %c15_i32_39 = arith.constant 15 : i32
    %119 = tpu.dynamic_rotate %91 by %c15_i32_39 dim 1 : vector<4x256xf32>, i32 -> vector<4x256xf32>
    %c2_40 = arith.constant 2 : index
    %c0_41 = arith.constant 0 : index
    %120 = vector.load %arg5[%c2_40, %c0_41] : memref<9x256xf32, #tpu.memory_space<vmem>>, vector<1x256xf32>
    %121 = vector.broadcast %120 : vector<1x256xf32> to vector<4x256xf32>
    %122 = arith.mulf %119, %121 : vector<4x256xf32>
    %123 = vector.broadcast %96 : vector<4x1xf32> to vector<4x256xf32>
    %124 = arith.mulf %123, %122 : vector<4x256xf32>
    %125 = arith.addf %118, %124 : vector<4x256xf32>
    %c1_i32_42 = arith.constant 1 : i32
    %126 = tpu.dynamic_rotate %91 by %c1_i32_42 dim 1 : vector<4x256xf32>, i32 -> vector<4x256xf32>
    %c3_43 = arith.constant 3 : index
    %c0_44 = arith.constant 0 : index
    %127 = vector.load %arg5[%c3_43, %c0_44] : memref<9x256xf32, #tpu.memory_space<vmem>>, vector<1x256xf32>
    %128 = vector.broadcast %127 : vector<1x256xf32> to vector<4x256xf32>
    %129 = arith.mulf %126, %128 : vector<4x256xf32>
    %130 = vector.broadcast %97 : vector<4x1xf32> to vector<4x256xf32>
    %131 = arith.mulf %130, %129 : vector<4x256xf32>
    %132 = arith.addf %125, %131 : vector<4x256xf32>
    %c255_i32_45 = arith.constant 255 : i32
    %133 = tpu.dynamic_rotate %91 by %c255_i32_45 dim 1 : vector<4x256xf32>, i32 -> vector<4x256xf32>
    %c5_46 = arith.constant 5 : index
    %c0_47 = arith.constant 0 : index
    %134 = vector.load %arg5[%c5_46, %c0_47] : memref<9x256xf32, #tpu.memory_space<vmem>>, vector<1x256xf32>
    %135 = vector.broadcast %134 : vector<1x256xf32> to vector<4x256xf32>
    %136 = arith.mulf %133, %135 : vector<4x256xf32>
    %137 = vector.broadcast %99 : vector<4x1xf32> to vector<4x256xf32>
    %138 = arith.mulf %137, %136 : vector<4x256xf32>
    %139 = arith.addf %132, %138 : vector<4x256xf32>
    %c241_i32_48 = arith.constant 241 : i32
    %140 = tpu.dynamic_rotate %91 by %c241_i32_48 dim 1 : vector<4x256xf32>, i32 -> vector<4x256xf32>
    %c6_49 = arith.constant 6 : index
    %c0_50 = arith.constant 0 : index
    %141 = vector.load %arg5[%c6_49, %c0_50] : memref<9x256xf32, #tpu.memory_space<vmem>>, vector<1x256xf32>
    %142 = vector.broadcast %141 : vector<1x256xf32> to vector<4x256xf32>
    %143 = arith.mulf %140, %142 : vector<4x256xf32>
    %144 = vector.broadcast %100 : vector<4x1xf32> to vector<4x256xf32>
    %145 = arith.mulf %144, %143 : vector<4x256xf32>
    %146 = arith.addf %139, %145 : vector<4x256xf32>
    %c240_i32_51 = arith.constant 240 : i32
    %147 = tpu.dynamic_rotate %91 by %c240_i32_51 dim 1 : vector<4x256xf32>, i32 -> vector<4x256xf32>
    %c7_52 = arith.constant 7 : index
    %c0_53 = arith.constant 0 : index
    %148 = vector.load %arg5[%c7_52, %c0_53] : memref<9x256xf32, #tpu.memory_space<vmem>>, vector<1x256xf32>
    %149 = vector.broadcast %148 : vector<1x256xf32> to vector<4x256xf32>
    %150 = arith.mulf %147, %149 : vector<4x256xf32>
    %151 = vector.broadcast %101 : vector<4x1xf32> to vector<4x256xf32>
    %152 = arith.mulf %151, %150 : vector<4x256xf32>
    %153 = arith.addf %146, %152 : vector<4x256xf32>
    %c239_i32_54 = arith.constant 239 : i32
    %154 = tpu.dynamic_rotate %91 by %c239_i32_54 dim 1 : vector<4x256xf32>, i32 -> vector<4x256xf32>
    %c8_55 = arith.constant 8 : index
    %c0_56 = arith.constant 0 : index
    %155 = vector.load %arg5[%c8_55, %c0_56] : memref<9x256xf32, #tpu.memory_space<vmem>>, vector<1x256xf32>
    %156 = vector.broadcast %155 : vector<1x256xf32> to vector<4x256xf32>
    %157 = arith.mulf %154, %156 : vector<4x256xf32>
    %158 = vector.broadcast %102 : vector<4x1xf32> to vector<4x256xf32>
    %159 = arith.mulf %158, %157 : vector<4x256xf32>
    %160 = arith.addf %153, %159 : vector<4x256xf32>
    %161 = arith.truncf %160 : vector<4x256xf32> to vector<4x256xbf16>
    %cst_57 = arith.constant dense<0.000000e+00> : vector<16x256xf32>
    %162 = tpu.matmul %2, %161, %cst_57 {dimension_numbers = #tpu.dot_dimension_numbers<[1], [0], [0], [1], [0, 0, 1, 1], [], []>} : vector<16x4xbf16>, vector<4x256xbf16>, vector<16x256xf32> -> vector<16x256xf32>
    %c0_58 = arith.constant 0 : index
    %c0_59 = arith.constant 0 : index
    %163 = vector.load %arg7[%c0_58, %c0_59] : memref<16x1xf32, #tpu.memory_space<vmem>>, vector<16x1xf32>
    %164 = vector.broadcast %163 : vector<16x1xf32> to vector<16x256xf32>
    %165 = arith.addf %162, %164 : vector<16x256xf32>
    %c1_60 = arith.constant 1 : index
    %c0_61 = arith.constant 0 : index
    %c0_62 = arith.constant 0 : index
    %166 = vector.load %arg8[%c1_60, %c0_61, %c0_62] : memref<2x16x256xf32, #tpu.memory_space<vmem>>, vector<1x16x256xf32>
    %167 = vector.shape_cast %166 : vector<1x16x256xf32> to vector<16x256xf32>
    %168 = vector.shape_cast %165 : vector<16x256xf32> to vector<1x16x256xf32>
    tpu.vector_store %arg8[%c1_60, %c0_61, %c0_62], %168 {strides = array<i32>} : memref<2x16x256xf32, #tpu.memory_space<vmem>>, vector<1x16x256xf32>,
    return
  }
  func.func @transform_0(%arg0: i32) -> (i32, i32, i32) {
    %c0_i32 = arith.constant 0 : i32
    %c0_i32_0 = arith.constant 0 : i32
    %c0_i32_1 = arith.constant 0 : i32
    return %arg0, %c0_i32, %c0_i32_0 : i32, i32, i32
  }
  func.func @transform_1(%arg0: i32) -> (i32, i32) {
    %c0_i32 = arith.constant 0 : i32
    %c0_i32_0 = arith.constant 0 : i32
    %c0_i32_1 = arith.constant 0 : i32
    return %c0_i32, %c0_i32_0 : i32, i32
  }
  func.func @transform_2(%arg0: i32) -> (i32, i32) {
    %c0_i32 = arith.constant 0 : i32
    %c0_i32_0 = arith.constant 0 : i32
    %c0_i32_1 = arith.constant 0 : i32
    return %c0_i32, %c0_i32_0 : i32, i32
  }
  func.func @transform_3(%arg0: i32) -> (i32, i32) {
    %c0_i32 = arith.constant 0 : i32
    %c0_i32_0 = arith.constant 0 : i32
    %c0_i32_1 = arith.constant 0 : i32
    return %c0_i32, %c0_i32_0 : i32, i32
  }
  func.func @transform_4(%arg0: i32) -> (i32, i32) {
    %c0_i32 = arith.constant 0 : i32
    %c0_i32_0 = arith.constant 0 : i32
    %c0_i32_1 = arith.constant 0 : i32
    return %c0_i32, %c0_i32_0 : i32, i32
  }
  func.func @transform_5(%arg0: i32) -> (i32, i32) {
    %c0_i32 = arith.constant 0 : i32
    %c0_i32_0 = arith.constant 0 : i32
    %c0_i32_1 = arith.constant 0 : i32
    return %c0_i32, %c0_i32_0 : i32, i32
  }
  func.func @transform_6(%arg0: i32) -> (i32, i32) {
    %c0_i32 = arith.constant 0 : i32
    %c0_i32_0 = arith.constant 0 : i32
    %c0_i32_1 = arith.constant 0 : i32
    return %c0_i32, %c0_i32_0 : i32, i32
  }
  func.func @transform_7(%arg0: i32) -> (i32, i32, i32) {
    %c0_i32 = arith.constant 0 : i32
    %c0_i32_0 = arith.constant 0 : i32
    %c0_i32_1 = arith.constant 0 : i32
    return %arg0, %c0_i32, %c0_i32_0 : i32, i32, i32
  }
}

</mosaic_0001>

<bundles_post_ra>
// kernel: ram_forward.1
= control target key start
LH: loop header
LB: loop body
LE: loop exit
PB: predicated region body
PF: predicated region fallthrough
CT: control target
= control target key end

     0   :  { %s1383_s24 = smov 0   ;;  %s1783_s0 = inlined_call_operand.vmem [shape: bf16[4,16,256], index: 0, kind: input, shape index: {}]   ;;  %s1784_s1 = inlined_call_operand.vmem [shape: bf16[4,16], index: 1, kind: input, shape index: {}]   ;;  %s1785_s2 = inlined_call_operand.vmem [shape: f32[4,1], index: 2, kind: input, shape index: {}]   ;;  %s1786_s3 = inlined_call_operand.vmem [shape: bf16[256,9], index: 3, kind: input, shape index: {}]   ;;  %s1787_s4 = inlined_call_operand.vmem [shape: f32[9,256], index: 4, kind: input, shape index: {}]   ;;  %s1788_s5 = inlined_call_operand.vmem [shape: bf16[16,4], index: 5, kind: input, shape index: {}]   ;;  %s1789_s6 = inlined_call_operand.vmem [shape: f32[16,1], index: 6, kind: input, shape index: {}]   ;;  %s1790_s7 = inlined_call_operand.vmem [shape: f32[4,16,256], index: 7, kind: output, shape index: {}]  }
   0x1 LB: > { %s1124_s25 = sadd.s32 4294967295, %s1324_s24   ;;  %p1128_p0 = scmp.ge.s32.totalorder %s1324_s24, 1  ;;  %s1324_s24 = sphi %s1383_s24, %s17_s24  }
   0x2   : > { %p239_p1 = scmp.lt.s32.totalorder %s1324_s24, 3 }
   0x4   : > { %p240_p2 = pnand %p1128_p0, %p239_p1 }
   0x5   : > { %s1129_s26 = sshll.u32 (!%p240_p2), %s1124_s25, 1  ;;  %s1327_s25 = smov (!%p240_p2), 17  }
   0x6   : > { %243 = sbr.rel (%p240_p2) target bundleno = 1014 (0x3f6), region = 48  ;;  %p274_p3 = scmp.lt.s32.totalorder (!%p240_p2), %s1129_s26, 3 }
   0x7   : > { %s1328_s27 = smov (!%p240_p2), 16   ;;  %s1329_s28 = smov (!%p240_p2), 127  }
   0x8   : > { %s1330_s29 = smov (!%p240_p2), 15   ;;  %s1331_s30 = smov (!%p240_p2), 113  }
   0x9   : > { %s1332_s8 = smov (!%p240_p2), 1   ;;  %s1333_s9 = smov (!%p240_p2), 112  }
   0xa   : > { %s1338_s10 = smov (!%p240_p2), 111  }
   0xb   : > { %v1258_v0 = vld [vmem:[%s1786_s3 + $0x38] sm:$0xff]  ;;  %v1326_v1 = vmov 0   ;;  %v325_v2 = vld [vmem:[%s1785_s2] sm:$0xf]  ;;  %v1257_v4 = vld [vmem:[%s1786_s3 + $0x30] sm:$0xff]  ;;  %s1792_s26 = smov (!%p274_p3, %s1129_s26), 3  ;;  %v506_v61 = vlaneseq }
   0xc   : > { %1297 = vset.pattern.permute.xlu0 %v1326_v1  ;;  %v1266_v3 = vld [vmem:[%s1786_s3 + $0x78] sm:$0xff]  ;;  %469 = vmatpush.bf16.msra.mxu2 %v1258_v0  ;;  %v1265_v5 = vld [vmem:[%s1786_s3 + $0x70] sm:$0xff]  ;;  %s1249_s14 = sshll.u32 %s1792_s26, 4  ;;  %v1256_v6 = vld [vmem:[%s1786_s3 + $0x28] sm:$0xff]  ;;  %vm341_vm0 = vcmask 130048   ;;  %v1334_v34 = vmov 2  }
   0xd   : > { %328 = vperm.xlu0 %1297, %v325_v2   ;;  %482 = vmatpush.bf16.msra.mxu3 %v1266_v3  ;;  %s1413_s17 = scalar_lea.vmem %s1783_s0, %s1249_s14  ;;  %v1264_v7 = vld [vmem:[%s1786_s3 + $0x68] sm:$0xff]  ;;  %v1428_v14 = vld [vmem:[%s1784_s1] sm:$0x3]  ;;  %v1254_v17 = vld [vmem:[%s1786_s3 + $0x18] sm:$0xff]  ;;  %v1335_v35 = vmov 4   ;;  %v1336_v41 = vmov 3  }
   0xe   : > { %v1137_v8 = vld [vmem:[%s1413_s17] sm:$0xf]  ;;  %v1269_v9 = vld [vmem:[%s1413_s17 + $0x4] sm:$0xf0]  ;;  %v1268_v10 = vld [vmem:[%s1413_s17 + $0x4] sm:$0xf]  ;;  %1300 = vset.pattern.permute.xlu1 %v1334_v34  ;;  %1298 = vset.pattern.permute.xlu2 %v1335_v35 }
   0xf   : > { %v1138_v11 = vor.u32 %v1269_v9, %v1137_v8  ;;  %v1139_v12 = vld [vmem:[%s1413_s17 + $0x8] sm:$0xf0]  ;;  %v1255_v15 = vld [vmem:[%s1786_s3 + $0x20] sm:$0xff]  ;;  %v1262_v18 = vld [vmem:[%s1786_s3 + $0x58] sm:$0xff]  ;;  %v1337_v42 = vmov 1   ;;  %v1339_v43 = vmov 8  }
  0x10   : > { %470 = vmatpush.bf16.msra.mxu2 %v1257_v4  ;;  %v1142_v13 = vor.u32 %v1268_v10, %v1139_v12  ;;  %v1263_v16 = vld [vmem:[%s1786_s3 + $0x60] sm:$0xff]  ;;  %v1253_v19 = vld [vmem:[%s1786_s3 + $0x10] sm:$0xff]  ;;  %v1252_v21 = vld [vmem:[%s1786_s3 + $0x8] sm:$0xff]  ;;  %v1340_v44 = vmov 5   ;;  %v1341_v45 = vmov 6   ;;  %v1342_v46 = vmov 7  }
  0x11   : > { %483 = vmatpush.bf16.msra.mxu3 %v1265_v5  ;;  %352 = vmatpush.bf16.msra.mxu0 %v1138_v11  ;;  %v1261_v20 = vld [vmem:[%s1786_s3 + $0x50] sm:$0xff]  ;;  %v1260_v22 = vld [vmem:[%s1786_s3 + $0x48] sm:$0xff]  ;;  %v1251_v23 = vld [vmem:[%s1786_s3] sm:$0xff]  ;;  %v1521_v62 = vand.u32 127, %v506_v61  ;;  %vm718_vm9 = vcmask 1041408   ;;  %vm714_vm10 = vcmask 31744  }
  0x12   : > { %365 = vmatpush.bf16.msra.mxu1 %v1142_v13  ;;  %v1259_v24 = vld [vmem:[%s1786_s3 + $0x40] sm:$0xff]  ;;  %s1250_s19 = sshll.u32 %s1792_s26, 5 }
  0x13   : > { %vm508_vm1 = vcmp.lt.s32.totalorder %v1521_v62, 17  ;;  %vm531_vm2 = vcmp.lt.s32.totalorder %v1521_v62, 16  ;;  %v1212_v9 = vld [vmem:[%s1787_s4 + $0x5] ss:$8 sm:$0x3]  ;;  %vm555_vm3 = vcmp.lt.s32.totalorder %v1521_v62, 15 }
  0x14   : > { %471 = vmatpush.bf16.msra.mxu2 %v1256_v6  ;;  %1143 = vmatmul.msk.bf16.vlgmr.msra.gmra.mxu0 %vm341_vm0, %v1428_v14  ;;  %vm603_vm4 = vcmp.lt.s32.totalorder %v1521_v62, 127  ;;  %vm627_vm5 = vcmp.lt.s32.totalorder %v1521_v62, 113  ;;  %vm579_vm6 = vcmp.lt.s32.totalorder %v1521_v62, 1  ;;  %vm651_vm7 = vcmp.lt.s32.totalorder %v1521_v62, 112 }
  0x15   : > { %484 = vmatpush.bf16.msra.mxu3 %v1264_v7  ;;  %1144 = vmatmul.msk.bf16.vlgmr.msra.gmra.mxu1 %vm341_vm0, %v1428_v14  ;;  %vm675_vm8 = vcmp.lt.s32.totalorder %v1521_v62, 111 }
  0x18   : > { %472 = vmatpush.bf16.msra.mxu2 %v1255_v15 }
  0x19   : > { %485 = vmatpush.bf16.msra.mxu3 %v1263_v16 }
  0x1c   : > { %473 = vmatpush.bf16.msra.mxu2 %v1254_v17 }
  0x1d   : > { %486 = vmatpush.bf16.msra.mxu3 %v1262_v18 }
  0x20   : > { %474 = vmatpush.bf16.msra.mxu2 %v1253_v19 }
  0x21   : > { %487 = vmatpush.bf16.msra.mxu3 %v1261_v20 }
  0x24   : > { %475 = vmatpush.bf16.msra.mxu2 %v1252_v21 }
  0x25   : > { %488 = vmatpush.bf16.msra.mxu3 %v1260_v22 }
  0x28   : > { %476 = vmatpush.bf16.msra.mxu2 %v1251_v23 }
  0x29   : > { %489 = vmatpush.bf16.msra.mxu3 %v1259_v24 }
  0x2c   : > { %804 = vmatpush.bf16.msrb.mxu2 %v1258_v0 }
  0x2d   : > { %817 = vmatpush.bf16.msrb.mxu3 %v1266_v3  ;;  %v511_v3 = vld [vmem:[%s1787_s4] ss:$8 sm:$0x3] }
  0x30   : > { %805 = vmatpush.bf16.msrb.mxu2 %v1257_v4  ;;  %v1209_v4 = vld [vmem:[%s1787_s4 + $0x1] ss:$8 sm:$0x3] }
  0x31   : > { %818 = vmatpush.bf16.msrb.mxu3 %v1265_v5  ;;  %v513_v5 = vperm.slane %v511_v3, 0  ;;  %v537_v10 = vperm.slane %v1209_v4, 0  ;;  %v538_v11 = vperm.slane %v1209_v4, 1 }
  0x34   : > { %806 = vmatpush.bf16.msrb.mxu2 %v1256_v6  ;;  %v514_v6 = vperm.slane %v511_v3, 1 }
  0x35   : > { %819 = vmatpush.bf16.msrb.mxu3 %v1264_v7 }
  0x38   : > { %807 = vmatpush.bf16.msrb.mxu2 %v1255_v15  ;;  %v1213_v15 = vld [vmem:[%s1787_s4 + $0x6] ss:$8 sm:$0x3] }
  0x39   : > { %820 = vmatpush.bf16.msrb.mxu3 %v1263_v16 }
  0x3c   : > { %808 = vmatpush.bf16.msrb.mxu2 %v1254_v17 }
  0x3d   : > { %821 = vmatpush.bf16.msrb.mxu3 %v1262_v18  ;;  %v1210_v18 = vld [vmem:[%s1787_s4 + $0x2] ss:$8 sm:$0x3] }
  0x40   : > { %809 = vmatpush.bf16.msrb.mxu2 %v1253_v19 }
  0x41   : > { %822 = vmatpush.bf16.msrb.mxu3 %v1261_v20  ;;  %v609_v20 = vperm.slane %v1212_v9, 0 }
  0x44   : > { %810 = vmatpush.bf16.msrb.mxu2 %v1252_v21  ;;  %v610_v21 = vperm.slane %v1212_v9, 1 }
  0x45   : > { %823 = vmatpush.bf16.msrb.mxu3 %v1260_v22 }
  0x48   : > { %811 = vmatpush.bf16.msrb.mxu2 %v1251_v23 }
  0x49   : > { %824 = vmatpush.bf16.msrb.mxu3 %v1259_v24 }
  0x7f   : > { %v329_v25 = vpop.permute.xlu0 %328 }
  0x91   : > { %v354_v26 = vpop.f32.mrf.mxu0 }
  0x92   : > { %v1464_v27 = vadd.f32 %v354_v26, %v329_v25  ;;  %v367_v28 = vpop.f32.mrf.mxu1  ;;  %v1211_v26 = vld [vmem:[%s1787_s4 + $0x3] ss:$8 sm:$0x3] }
  0x93   : > { %v1466_v29 = vadd.f32 %v367_v28, %v329_v25  ;;  %v586_v61 = vperm.slane %v1211_v26, 1 }
  0x94   : > { %502 = vrot.lane.b32.xlu0 %v1464_v27, %s1327_s25  ;;  %v371_v30 = vpack.c.bf16 %v1464_v27, %v1464_v27 }
  0x95   : > { %529 = vrot.lane.b32.xlu2 %v1466_v29, %s1328_s27  ;;  %504 = vrot.lane.b32.xlu1 %v1466_v29, %s1327_s25  ;;  %v372_v31 = vpack.c.bf16 %v1466_v29, %v1466_v29 }
  0x96   : > { %477 = vmatmul.bf16.vlgmr.msra.gmra.mxu2 %v371_v30 }
  0x97   : > { %490 = vmatmul.bf16.vlgmr.msra.gmra.mxu3 %v372_v31  ;;  %v633_v31 = vperm.slane %v1213_v15, 0 }
  0x99   : > { %v356_v32 = vpop.f32.mrf.mxu0 }
  0x9a   : > { %v369_v33 = vpop.f32.mrf.mxu1  ;;  %v561_v32 = vperm.slane %v1210_v18, 0 }
  0x9b   : > { %v562_v33 = vperm.slane %v1210_v18, 1 }
  0x9c   : > { %601 = vrot.lane.b32.xlu0 %v1466_v29, %s1329_s28 }
  0x9d   : > { %553 = vrot.lane.b32.xlu2 %v1466_v29, %s1330_s29  ;;  %527 = vrot.lane.b32.xlu1 %v1464_v27, %s1328_s27 }
  0xa4   : > { %625 = vrot.lane.b32.xlu0 %v1466_v29, %s1331_s30 }
  0xa5   : > { %577 = vrot.lane.b32.xlu2 %v1466_v29, %s1332_s8  ;;  %551 = vrot.lane.b32.xlu1 %v1464_v27, %s1330_s29 }
  0xac   : > { %649 = vrot.lane.b32.xlu0 %v1466_v29, %s1333_s9 }
  0xad   : > { %599 = vrot.lane.b32.xlu2 %v1464_v27, %s1329_s28  ;;  %575 = vrot.lane.b32.xlu1 %v1464_v27, %s1332_s8 }
  0xb5   : > { %623 = vrot.lane.b32.xlu2 %v1464_v27, %s1331_s30 }
  0xbd   : > { %647 = vrot.lane.b32.xlu2 %v1464_v27, %s1333_s9 }
  0xef   : > { %v530_v47 = vpop.permute.xlu2 %529 }
  0xf7   : > { %v554_v49 = vpop.permute.xlu2 %553 }
  0xff   : > { %v1513_v52 = vpop.permute.xlu2 %577 }
 0x106   : > { %v503_v50 = vpop.permute.xlu0 %502 }
 0x107   : > { %v505_v48 = vpop.permute.xlu1 %504  ;;  %v600_v55 = vpop.permute.xlu2 %599 }
 0x108   : > { %v509_v7 = vsel %vm508_vm1, %v503_v50, %v505_v48  ;;  %v510_v8 = vsel %vm508_vm1, %v505_v48, %v503_v50  ;;  %v585_v48 = vperm.slane %v1211_v26, 0 }
 0x109   : > { %v517_v16 = vmul.f32 %v513_v5, %v510_v8  ;;  %v518_v17 = vmul.f32 %v514_v6, %v509_v7 }
 0x10e   : > { %v602_v53 = vpop.permute.xlu0 %601 }
 0x10f   : > { %v528_v51 = vpop.permute.xlu1 %527  ;;  %v624_v58 = vpop.permute.xlu2 %623  ;;  %v604_v50 = vsel %vm603_vm4, %v600_v55, %v602_v53 }
 0x110   : > { %v532_v12 = vsel %vm531_vm2, %v528_v51, %v530_v47  ;;  %v533_v13 = vsel %vm531_vm2, %v530_v47, %v528_v51  ;;  %v1214_v51 = vld [vmem:[%s1787_s4 + $0x7] ss:$8 sm:$0x3] }
 0x111   : > { %v541_v24 = vmul.f32 %v537_v10, %v533_v13  ;;  %v542_v25 = vmul.f32 %v538_v11, %v532_v12  ;;  %v657_v8 = vperm.slane %v1214_v51, 0  ;;  %v658_v9 = vperm.slane %v1214_v51, 1  ;;  %v1215_v10 = vld [vmem:[%s1787_s4 + $0x10] ss:$8 sm:$0x3] }
 0x116   : > { %v626_v56 = vpop.permute.xlu0 %625 }
 0x117   : > { %v552_v54 = vpop.permute.xlu1 %551  ;;  %v1523_v0 = vpop.permute.xlu2 %647  ;;  %v628_v3 = vsel %vm627_vm5, %v624_v58, %v626_v56 }
 0x118   : > { %v556_v47 = vsel %vm555_vm3, %v552_v54, %v554_v49  ;;  %v637_v13 = vmul.f32 %v633_v31, %v628_v3 }
 0x119   : > { %v478_v36 = vpop.f32.mrf.mxu2  ;;  %v566_v4 = vmul.f32 %v562_v33, %v556_v47 }
 0x11a   : > { %v491_v37 = vpop.f32.mrf.mxu3 }
 0x11b   : > { %v492_v38 = vadd.f32 %v491_v37, %v478_v36  ;;  %v557_v36 = vsel %vm555_vm3, %v554_v49, %v552_v54  ;;  %v629_v49 = vsel %vm627_vm5, %v626_v56, %v624_v58 }
 0x11c   : > { %v565_v54 = vmul.f32 %v561_v32, %v557_v36 }
 0x11d   : > { %568 = vperm.xlu1 %1300, %v492_v38   ;;  %520 = vperm.xlu0 %1297, %v492_v38  }
 0x11e   : > { %497 = vperm.xlu2 %1298, %v492_v38   ;;  %v1517_v59 = vpop.permute.xlu0 %649 }
 0x11f   : > { %v1515_v57 = vpop.permute.xlu1 %575 }
 0x120   : > { %v581_v5 = vsel %vm579_vm6, %v1513_v52, %v1515_v57 }
 0x121   : > { %v480_v39 = vpop.f32.mrf.mxu2 }
 0x122   : > { %v493_v40 = vpop.f32.mrf.mxu3 }
 0x125   : > { %1301 = vset.pattern.permute.xlu1 %v1336_v41  ;;  %1299 = vset.pattern.permute.xlu0 %v1337_v42 }
 0x126   : > { %671 = vrot.lane.b32.xlu2 %v1464_v27, %s1338_s10  ;;  %592 = vperm.xlu1 %1301, %v492_v38  }
 0x127   : > { %544 = vperm.xlu0 %1299, %v492_v38   ;;  %1305 = vset.pattern.permute.xlu2 %v1339_v43 }
 0x12e   : > { %688 = vperm.xlu2 %1305, %v492_v38   ;;  %1302 = vset.pattern.permute.xlu1 %v1340_v44 }
 0x12f   : > { %673 = vrot.lane.b32.xlu0 %v1466_v29, %s1338_s10  ;;  %616 = vperm.xlu1 %1302, %v492_v38  }
 0x130   : > { %1306 = vset.pattern.permute.xlu0 %v1326_v1 }
 0x136   : > { %1309 = vset.pattern.permute.xlu2 %v1337_v42  ;;  %v634_v42 = vperm.slane %v1213_v15, 1 }
 0x137   : > { %1303 = vset.pattern.permute.xlu1 %v1341_v45 }
 0x138   : > { %640 = vperm.xlu1 %1303, %v492_v38   ;;  %v638_v15 = vmul.f32 %v634_v42, %v629_v49  ;;  %v1226_v49 = vld [vmem:[%s1413_s17 + $0x10] sm:$0xf] }
 0x140   : > { %1304 = vset.pattern.permute.xlu1 %v1342_v46 }
 0x141   : > { %664 = vperm.xlu1 %1304, %v492_v38  }
 0x149   : > { %1308 = vset.pattern.permute.xlu1 %v1326_v1 }
 0x178   : > { %v498_v19 = vpop.permute.xlu2 %497 }
 0x179   : > { %v500_v37 = vmul.f32 %v498_v19, %v1464_v27  ;;  %v501_v38 = vmul.f32 %v498_v19, %v1466_v29  ;;  %v605_v29 = vsel %vm603_vm4, %v602_v53, %v600_v55  ;;  %v580_v53 = vsel %vm579_vm6, %v1515_v57, %v1513_v52 }
 0x17a   : > { %v613_v55 = vmul.f32 %v609_v20, %v604_v50  ;;  %v614_v12 = vmul.f32 %v610_v21, %v605_v29  ;;  %v590_v18 = vmul.f32 %v586_v61, %v580_v53  ;;  %v652_v57 = vsel %vm651_vm7, %v1523_v0, %v1517_v59 }
 0x17b   : > { %v681_v20 = vperm.slane %v1215_v10, 0  ;;  %v682_v21 = vperm.slane %v1215_v10, 1  ;;  %v1618_v10 = vld [vmem:[%s1788_s5] sm:$0xff] }
 0x18f   : > { %v1519_v60 = vpop.permute.xlu1 %568  ;;  %v521_v63 = vpop.permute.xlu0 %520 }
 0x190   : > { %v523_v28 = vmul.f32 %v521_v63, %v517_v16  ;;  %v524_v30 = vmul.f32 %v521_v63, %v518_v17  ;;  %v571_v56 = vmul.f32 %v1519_v60, %v565_v54  ;;  %v572_v58 = vmul.f32 %v1519_v60, %v566_v4  ;;  %v672_v17 = vpop.permute.xlu2 %671  ;;  %v1271_v54 = vld [vmem:[%s1413_s17 + $0x14] sm:$0xf0]  ;;  %v1270_v4 = vld [vmem:[%s1413_s17 + $0x14] sm:$0xf] }
 0x191   : > { %v589_v16 = vmul.f32 %v585_v48, %v581_v5  ;;  %v653_v60 = vsel %vm651_vm7, %v1517_v59, %v1523_v0  ;;  %v760_v59 = vld [vmem:[%s1785_s2] sm:$0xf]  ;;  %v661_v0 = vmul.f32 %v657_v8, %v652_v57  ;;  %v1228_v5 = vld [vmem:[%s1413_s17 + $0x18] sm:$0xf0] }
 0x192   : > { %v525_v27 = vadd.f32 %v523_v28, %v500_v37  ;;  %v526_v63 = vadd.f32 %v524_v30, %v501_v38  ;;  %v662_v38 = vmul.f32 %v658_v9, %v653_v60  ;;  %763 = vperm.xlu0 %1306, %v760_v59   ;;  %v1231_v9 = vor.u32 %v1270_v4, %v1228_v5 }
 0x198   : > { %v1525_v2 = vpop.permute.xlu1 %592  ;;  %v689_v61 = vpop.permute.xlu2 %688 }
 0x199   : > { %v545_v22 = vpop.permute.xlu0 %544 }
 0x19a   : > { %v547_v39 = vmul.f32 %v545_v22, %v541_v24  ;;  %v548_v40 = vmul.f32 %v545_v22, %v542_v25  ;;  %v595_v24 = vmul.f32 %v1525_v2, %v589_v16  ;;  %v596_v25 = vmul.f32 %v1525_v2, %v590_v18  ;;  %1307 = vset.pattern.permute.xlu0 %v1335_v35 }
 0x19c   : > { %v549_v6 = vadd.f32 %v547_v39, %v525_v27  ;;  %v550_v7 = vadd.f32 %v548_v40, %v526_v63 }
 0x19e   : > { %v573_v19 = vadd.f32 %v571_v56, %v549_v6  ;;  %v574_v22 = vadd.f32 %v572_v58, %v550_v7 }
 0x1a0   : > { %v597_v32 = vadd.f32 %v595_v24, %v573_v19  ;;  %v598_v33 = vadd.f32 %v596_v25, %v574_v22 }
 0x1a1   : > { %v617_v23 = vpop.permute.xlu1 %616  ;;  %v674_v52 = vpop.permute.xlu0 %673 }
 0x1a2   : > { %v619_v26 = vmul.f32 %v617_v23, %v613_v55  ;;  %v620_v28 = vmul.f32 %v617_v23, %v614_v12  ;;  %v676_v30 = vsel %vm675_vm8, %v672_v17, %v674_v52  ;;  %v677_v31 = vsel %vm675_vm8, %v674_v52, %v672_v17 }
 0x1a3   : > { %v685_v2 = vmul.f32 %v681_v20, %v676_v30  ;;  %v686_v23 = vmul.f32 %v682_v21, %v677_v31  ;;  %v1227_v55 = vor.u32 %v1271_v54, %v1226_v49 }
 0x1a4   : > { %v621_v39 = vadd.f32 %v619_v26, %v597_v32  ;;  %v622_v40 = vadd.f32 %v620_v28, %v598_v33 }
 0x1a5   : > { %v691_v27 = vmul.f32 %v689_v61, %v685_v2  ;;  %v692_v63 = vmul.f32 %v689_v61, %v686_v23 }
 0x1aa   : > { %v641_v11 = vpop.permute.xlu1 %640 }
 0x1ab   : > { %v643_v36 = vmul.f32 %v641_v11, %v637_v13  ;;  %v644_v37 = vmul.f32 %v641_v11, %v638_v15 }
 0x1ad   : > { %v645_v47 = vadd.f32 %v643_v36, %v621_v39  ;;  %v646_v48 = vadd.f32 %v644_v37, %v622_v40 }
 0x1b3   : > { %v665_v42 = vpop.permute.xlu1 %664 }
 0x1b4   : > { %v667_v50 = vmul.f32 %v665_v42, %v661_v0  ;;  %v668_v51 = vmul.f32 %v665_v42, %v662_v38  ;;  %v843_v0 = vld [vmem:[%s1787_s4] ss:$8 sm:$0x3] }
 0x1b5   : > { %v845_v23 = vperm.slane %v843_v0, 0  ;;  %v846_v39 = vperm.slane %v843_v0, 1 }
 0x1b6   : > { %v669_v29 = vadd.f32 %v667_v50, %v645_v47  ;;  %v670_v3 = vadd.f32 %v668_v51, %v646_v48  ;;  %v1234_v47 = vld [vmem:[%s1787_s4 + $0x1] ss:$8 sm:$0x3] }
 0x1b7   : > { %v867_v51 = vperm.slane %v1234_v47, 0  ;;  %v868_v61 = vperm.slane %v1234_v47, 1 }
 0x1b8   : > { %v693_v6 = vadd.f32 %v691_v27, %v669_v29  ;;  %v694_v7 = vadd.f32 %v692_v63, %v670_v3  ;;  %v1235_v27 = vld [vmem:[%s1787_s4 + $0x2] ss:$8 sm:$0x3] }
 0x1ba   : > { %v695_v8 = vpack.c.bf16 %v693_v6, %v693_v6  ;;  %v696_v53 = vpack.c.bf16 %v694_v7, %v694_v7  ;;  %v889_v7 = vperm.slane %v1235_v27, 0 }
 0x1bc   : > { %v720_v56 = vsel %vm718_vm9, %v695_v8, 0  ;;  %v723_v58 = vsel %vm718_vm9, %v696_v53, 0  ;;  %v890_v8 = vperm.slane %v1235_v27, 1 }
 0x1bd   : > { %732 = vmatpush.bf16.msrb.mxu0 %v720_v56  ;;  %746 = vmatpush.bf16.msrb.mxu1 %v723_v58  ;;  %v1236_v56 = vld [vmem:[%s1787_s4 + $0x3] ss:$8 sm:$0x3]  ;;  %v1237_v58 = vld [vmem:[%s1787_s4 + $0x5] ss:$8 sm:$0x3] }
 0x1c0   : > { %1220 = vmatmul.msk.bf16.vlgmr.msrb.gmra.mxu0 %vm714_vm10, %v1618_v10  ;;  %1221 = vmatmul.msk.bf16.vlgmr.msrb.gmra.mxu1 %vm714_vm10, %v1618_v10 }
 0x1c1   : > { %783 = vmatpush.bf16.msra.mxu0 %v1227_v55  ;;  %796 = vmatpush.bf16.msra.mxu1 %v1231_v9 }
 0x1d0   : > { %1232 = vmatmul.msk.bf16.vlgmr.msra.gmra.mxu0 %vm341_vm0, %v1428_v14  ;;  %1233 = vmatmul.msk.bf16.vlgmr.msra.gmra.mxu1 %vm341_vm0, %v1428_v14 }
 0x204   : > { %v764_v15 = vpop.permute.xlu0 %763 }
 0x23d   : > { %v1628_v35 = vpop.f32.mrf.mxu0  ;;  %v1630_v11 = vpop.f32.mrf.mxu1 }
 0x245   : > { %v1632_v12 = vpop.f32.mrf.mxu0  ;;  %v1634_v13 = vpop.f32.mrf.mxu1 }
 0x24d   : > { %v785_v16 = vpop.f32.mrf.mxu0  ;;  %v798_v17 = vpop.f32.mrf.mxu1 }
 0x24e   : > { %v1636_v18 = vadd.f32 %v785_v16, %v764_v15  ;;  %v1638_v19 = vadd.f32 %v798_v17, %v764_v15 }
 0x250   : > { %839 = vrot.lane.b32.xlu2 %v1638_v19, %s1327_s25  ;;  %903 = vrot.lane.b32.xlu0 %v1636_v18, %s1332_s8  ;;  %v802_v14 = vpack.c.bf16 %v1636_v18, %v1636_v18  ;;  %v803_v22 = vpack.c.bf16 %v1638_v19, %v1638_v19 }
 0x251   : > { %837 = vrot.lane.b32.xlu1 %v1636_v18, %s1327_s25 }
 0x252   : > { %812 = vmatmul.bf16.vlgmr.msrb.gmra.mxu2 %v802_v14  ;;  %825 = vmatmul.bf16.vlgmr.msrb.gmra.mxu3 %v803_v22 }
 0x255   : > { %v787_v52 = vpop.f32.mrf.mxu0  ;;  %v800_v57 = vpop.f32.mrf.mxu1 }
 0x256   : > { %v911_v52 = vperm.slane %v1236_v56, 0  ;;  %v912_v57 = vperm.slane %v1236_v56, 1 }
 0x258   : > { %861 = vrot.lane.b32.xlu2 %v1638_v19, %s1328_s27  ;;  %925 = vrot.lane.b32.xlu0 %v1636_v18, %s1329_s28 }
 0x259   : > { %859 = vrot.lane.b32.xlu1 %v1636_v18, %s1328_s27  ;;  %s1760_s27 = scalar_lea.vmem %s1790_s7, %s1250_s19 }
 0x260   : > { %947 = vrot.lane.b32.xlu0 %v1636_v18, %s1331_s30  ;;  %881 = vrot.lane.b32.xlu2 %v1636_v18, %s1330_s29 }
 0x261   : > { %883 = vrot.lane.b32.xlu1 %v1638_v19, %s1330_s29 }
 0x268   : > { %969 = vrot.lane.b32.xlu0 %v1636_v18, %s1333_s9 }
 0x269   : > { %905 = vrot.lane.b32.xlu1 %v1638_v19, %s1332_s8 }
 0x271   : > { %927 = vrot.lane.b32.xlu1 %v1638_v19, %s1329_s28 }
 0x279   : > { %949 = vrot.lane.b32.xlu1 %v1638_v19, %s1331_s30 }
 0x2aa   : > { %v840_v26 = vpop.permute.xlu2 %839 }
 0x2c2   : > { %v904_v31 = vpop.permute.xlu0 %903 }
 0x2ca   : > { %v926_v33 = vpop.permute.xlu0 %925 }
 0x2d2   : > { %v948_v37 = vpop.permute.xlu0 %947 }
 0x2d5   : > { %v813_v60 = vpop.f32.mrf.mxu2  ;;  %v826_v20 = vpop.f32.mrf.mxu3 }
 0x2d6   : > { %v827_v21 = vadd.f32 %v826_v20, %v813_v60  ;;  %v933_v60 = vperm.slane %v1237_v58, 0  ;;  %v934_v20 = vperm.slane %v1237_v58, 1 }
 0x2d8   : > { %874 = vperm.xlu2 %1309, %v827_v21   ;;  %852 = vperm.xlu1 %1308, %v827_v21  }
 0x2d9   : > { %832 = vperm.xlu0 %1307, %v827_v21  }
 0x2da   : > { %v1693_v38 = vpop.permute.xlu0 %969 }
 0x2dd   : > { %v815_v24 = vpop.f32.mrf.mxu2  ;;  %v828_v25 = vpop.f32.mrf.mxu3 }
 0x2e0   : > { %1310 = vset.pattern.permute.xlu2 %v1334_v34  ;;  %971 = vrot.lane.b32.xlu1 %v1638_v19, %s1333_s9  ;;  %v697_v34 = vld [vmem:[%s1789_s6] sm:$0xff] }
 0x2e1   : > { %991 = vrot.lane.b32.xlu0 %v1636_v18, %s1338_s10  ;;  %896 = vperm.xlu2 %1310, %v827_v21  }
 0x2e2   : > { %1315 = vset.pattern.permute.xlu0 %v1339_v43  ;;  %v838_v43 = vpop.permute.xlu1 %837 }
 0x2e3   : > { %v841_v40 = vsel %vm508_vm1, %v838_v43, %v840_v26  ;;  %v842_v42 = vsel %vm508_vm1, %v840_v26, %v838_v43 }
 0x2e4   : > { %v849_v48 = vmul.f32 %v845_v23, %v842_v42  ;;  %v850_v50 = vmul.f32 %v846_v39, %v841_v40 }
 0x2e8   : > { %993 = vrot.lane.b32.xlu1 %v1638_v19, %s1338_s10 }
 0x2e9   : > { %1006 = vperm.xlu0 %1315, %v827_v21   ;;  %1311 = vset.pattern.permute.xlu2 %v1336_v41  ;;  %v698_v41 = vld [vmem:[%s1789_s6 + $0x8] sm:$0xff] }
 0x2ea   : > { %918 = vperm.xlu2 %1311, %v827_v21   ;;  %v860_v28 = vpop.permute.xlu1 %859 }
 0x2f0   : > { %701 = vperm.xlu1 %1308, %v697_v34  }
 0x2f1   : > { %1317 = vset.pattern.permute.xlu0 %v1326_v1 }
 0x2f2   : > { %1312 = vset.pattern.permute.xlu2 %v1340_v44  ;;  %v862_v44 = vpop.permute.xlu2 %861  ;;  %v884_v30 = vpop.permute.xlu1 %883 }
 0x2f3   : > { %940 = vperm.xlu2 %1312, %v827_v21   ;;  %v863_v29 = vsel %vm531_vm2, %v860_v28, %v862_v44  ;;  %v864_v3 = vsel %vm531_vm2, %v862_v44, %v860_v28 }
 0x2f4   : > { %v871_v55 = vmul.f32 %v867_v51, %v864_v3  ;;  %v872_v9 = vmul.f32 %v868_v61, %v863_v29 }
 0x2f8   : > { %1019 = vperm.xlu1 %1308, %v697_v34  }
 0x2fa   : > { %v882_v32 = vpop.permute.xlu2 %881 }
 0x2fb   : > { %1313 = vset.pattern.permute.xlu2 %v1341_v45  ;;  %v906_v45 = vpop.permute.xlu1 %905  ;;  %v885_v17 = vsel %vm555_vm3, %v882_v32, %v884_v30 }
 0x2fc   : > { %962 = vperm.xlu2 %1313, %v827_v21   ;;  %v894_v24 = vmul.f32 %v890_v8, %v885_v17  ;;  %v907_v43 = vsel %vm579_vm6, %v904_v31, %v906_v45  ;;  %v908_v26 = vsel %vm579_vm6, %v906_v45, %v904_v31  ;;  %v1239_v45 = vld [vmem:[%s1787_s4 + $0x7] ss:$8 sm:$0x3] }
 0x2fd   : > { %v915_v40 = vmul.f32 %v911_v52, %v908_v26  ;;  %v916_v42 = vmul.f32 %v912_v57, %v907_v43  ;;  %v977_v27 = vperm.slane %v1239_v45, 0 }
 0x304   : > { %1314 = vset.pattern.permute.xlu2 %v1342_v46  ;;  %v928_v46 = vpop.permute.xlu1 %927 }
 0x305   : > { %984 = vperm.xlu2 %1314, %v827_v21  }
 0x30d   : > { %1316 = vset.pattern.permute.xlu2 %v1326_v1  ;;  %v950_v1 = vpop.permute.xlu1 %949 }
 0x30e   : > { %706 = vperm.xlu2 %1316, %v698_v41   ;;  %v951_v23 = vsel %vm627_vm5, %v948_v37, %v950_v1  ;;  %v952_v39 = vsel %vm627_vm5, %v950_v1, %v948_v37 }
 0x316   : > { %1024 = vperm.xlu2 %1316, %v698_v41  }
 0x332   : > { %v875_v36 = vpop.permute.xlu2 %874 }
 0x333   : > { %v877_v14 = vmul.f32 %v875_v36, %v871_v55  ;;  %v878_v22 = vmul.f32 %v875_v36, %v872_v9 }
 0x33b   : > { %v897_v59 = vpop.permute.xlu2 %896 }
 0x33c   : > { %v900_v0 = vmul.f32 %v897_v59, %v894_v24 }
 0x344   : > { %v1695_v2 = vpop.permute.xlu2 %918 }
 0x345   : > { %v921_v37 = vmul.f32 %v1695_v2, %v915_v40  ;;  %v922_v1 = vmul.f32 %v1695_v2, %v916_v42 }
 0x34a   : > { %v853_v63 = vpop.permute.xlu1 %852 }
 0x34b   : > { %v855_v49 = vmul.f32 %v853_v63, %v849_v48  ;;  %v856_v54 = vmul.f32 %v853_v63, %v850_v50  ;;  %v833_v4 = vpop.permute.xlu0 %832  ;;  %v978_v63 = vperm.slane %v1239_v45, 1 }
 0x34c   : > { %v835_v5 = vmul.f32 %v833_v4, %v1636_v18  ;;  %v836_v6 = vmul.f32 %v833_v4, %v1638_v19  ;;  %v886_v18 = vsel %vm555_vm3, %v884_v30, %v882_v32  ;;  %v1238_v19 = vld [vmem:[%s1787_s4 + $0x6] ss:$8 sm:$0x3]  ;;  %v929_v30 = vsel %vm603_vm4, %v926_v33, %v928_v46 }
 0x34d   : > { %v941_v53 = vpop.permute.xlu2 %940  ;;  %v893_v21 = vmul.f32 %v889_v7, %v886_v18  ;;  %v955_v28 = vperm.slane %v1238_v19, 0  ;;  %v956_v44 = vperm.slane %v1238_v19, 1  ;;  %v930_v32 = vsel %vm603_vm4, %v928_v46, %v926_v33  ;;  %v1240_v33 = vld [vmem:[%s1787_s4 + $0x10] ss:$8 sm:$0x3] }
 0x34e   : > { %v857_v15 = vadd.f32 %v855_v49, %v835_v5  ;;  %v858_v16 = vadd.f32 %v856_v54, %v836_v6  ;;  %v937_v46 = vmul.f32 %v933_v60, %v929_v30  ;;  %v999_v29 = vperm.slane %v1240_v33, 0 }
 0x34f   : > { %v899_v36 = vmul.f32 %v897_v59, %v893_v21  ;;  %v938_v59 = vmul.f32 %v934_v20, %v930_v32  ;;  %v959_v51 = vmul.f32 %v955_v28, %v951_v23  ;;  %v960_v61 = vmul.f32 %v956_v44, %v952_v39 }
 0x350   : > { %v879_v25 = vadd.f32 %v877_v14, %v857_v15  ;;  %v880_v34 = vadd.f32 %v878_v22, %v858_v16  ;;  %v1000_v3 = vperm.slane %v1240_v33, 1  ;;  %v943_v8 = vmul.f32 %v941_v53, %v937_v46 }
 0x351   : > { %v944_v55 = vmul.f32 %v941_v53, %v938_v59 }
 0x352   : > { %v972_v41 = vpop.permute.xlu1 %971  ;;  %v901_v47 = vadd.f32 %v899_v36, %v879_v25  ;;  %v902_v31 = vadd.f32 %v900_v0, %v880_v34 }
 0x353   : > { %v992_v50 = vpop.permute.xlu0 %991  ;;  %v973_v4 = vsel %vm651_vm7, %v1693_v38, %v972_v41  ;;  %v974_v5 = vsel %vm651_vm7, %v972_v41, %v1693_v38 }
 0x354   : > { %v923_v49 = vadd.f32 %v921_v37, %v901_v47  ;;  %v924_v54 = vadd.f32 %v922_v1, %v902_v31  ;;  %v981_v58 = vmul.f32 %v977_v27, %v973_v4  ;;  %v982_v15 = vmul.f32 %v978_v63, %v974_v5 }
 0x356   : > { %v963_v48 = vpop.permute.xlu2 %962  ;;  %v945_v16 = vadd.f32 %v943_v8, %v923_v49  ;;  %v946_v17 = vadd.f32 %v944_v55, %v924_v54 }
 0x357   : > { %v965_v9 = vmul.f32 %v963_v48, %v959_v51  ;;  %v966_v56 = vmul.f32 %v963_v48, %v960_v61 }
 0x359   : > { %v967_v38 = vadd.f32 %v965_v9, %v945_v16  ;;  %v968_v22 = vadd.f32 %v966_v56, %v946_v17 }
 0x35a   : > { %v994_v6 = vpop.permute.xlu1 %993 }
 0x35b   : > { %v995_v7 = vsel %vm675_vm8, %v992_v50, %v994_v6  ;;  %v996_v2 = vsel %vm675_vm8, %v994_v6, %v992_v50  ;;  %v1007_v60 = vpop.permute.xlu0 %1006 }
 0x35c   : > { %v1003_v18 = vmul.f32 %v999_v29, %v995_v7  ;;  %v1004_v19 = vmul.f32 %v1000_v3, %v996_v2 }
 0x35e   : > { %v1009_v20 = vmul.f32 %v1007_v60, %v1003_v18  ;;  %v1010_v62 = vmul.f32 %v1007_v60, %v1004_v19 }
 0x35f   : > { %v985_v14 = vpop.permute.xlu2 %984 }
 0x360   : > { %v987_v52 = vmul.f32 %v985_v14, %v981_v58  ;;  %v988_v57 = vmul.f32 %v985_v14, %v982_v15 }
 0x362   : > { %v989_v21 = vadd.f32 %v987_v52, %v967_v38  ;;  %v990_v24 = vadd.f32 %v988_v57, %v968_v22  ;;  %v702_v53 = vpop.permute.xlu1 %701 }
 0x363   : > { %v735_v25 = vadd.f32 %v1628_v35, %v702_v53  ;;  %v749_v34 = vadd.f32 %v1630_v11, %v702_v53 }
 0x364   : > { %v1011_v41 = vadd.f32 %v1009_v20, %v989_v21  ;;  %v1012_v43 = vadd.f32 %v1010_v62, %v990_v24 }
 0x365   : > { %753 = vst [vmem:[%s1760_s27] sm:$0xff] %v735_v25 }
 0x366   : > { %754 = vst [vmem:[%s1760_s27 + $0x8] sm:$0xff] %v749_v34  ;;  %v1013_v26 = vpack.c.bf16 %v1011_v41, %v1011_v41  ;;  %v1014_v28 = vpack.c.bf16 %v1012_v43, %v1012_v43 }
 0x368   : > { %v707_v44 = vpop.permute.xlu2 %706  ;;  %v1028_v30 = vsel %vm718_vm9, %v1013_v26, 0  ;;  %v1031_v32 = vsel %vm718_vm9, %v1014_v28, 0 }
 0x369   : > { %v737_v36 = vadd.f32 %v1632_v12, %v707_v44  ;;  %v751_v35 = vadd.f32 %v1634_v13, %v707_v44  ;;  %1040 = vmatpush.bf16.msrb.mxu0 %v1028_v30  ;;  %1054 = vmatpush.bf16.msrb.mxu1 %v1031_v32 }
 0x36a   : > { %v1020_v11 = vpop.permute.xlu1 %1019 }
 0x36b   : > { %755 = vst [vmem:[%s1760_s27 + $0x10] sm:$0xff] %v737_v36 }
 0x36c   : > { %756 = vst [vmem:[%s1760_s27 + $0x18] sm:$0xff] %v751_v35  ;;  %1241 = vmatmul.msk.bf16.vlgmr.msrb.gmra.mxu0 %vm714_vm10, %v1618_v10  ;;  %1242 = vmatmul.msk.bf16.vlgmr.msrb.gmra.mxu1 %vm714_vm10, %v1618_v10 }
 0x370   : > { %v1025_v12 = vpop.permute.xlu2 %1024 }
 0x3e9   : > { %v1042_v0 = vpop.f32.mrf.mxu0  ;;  %v1056_v23 = vpop.f32.mrf.mxu1 }
 0x3ea   : > { %v1043_v39 = vadd.f32 %v1042_v0, %v1020_v11  ;;  %v1057_v40 = vadd.f32 %v1056_v23, %v1020_v11 }
 0x3ec   : > { %1243 = vst [vmem:[%s1760_s27 + $0x20] sm:$0xff] %v1043_v39 }
 0x3ed   : > { %1244 = vst [vmem:[%s1760_s27 + $0x28] sm:$0xff] %v1057_v40 }
 0x3f1   : > { %v1044_v13 = vpop.f32.mrf.mxu0  ;;  %v1058_v42 = vpop.f32.mrf.mxu1 }
 0x3f2   : > { %v1045_v47 = vadd.f32 %v1044_v13, %v1025_v12  ;;  %v1059_v31 = vadd.f32 %v1058_v42, %v1025_v12 }
 0x3f4   : > { %1245 = vst [vmem:[%s1760_s27 + $0x30] sm:$0xff] %v1045_v47 }
 0x3f5   : > { %1246 = vst [vmem:[%s1760_s27 + $0x38] sm:$0xff] %v1059_v31 }
 0x3f6 PF: > { %s17_s24 = sadd.s32 1, %s1324_s24  }
 0x3f7   : > { %p14_p4 = scmp.ge.s32.totalorder %s17_s24, 4  }
 0x3f9   :  { %16 = sbr.rel (!%p14_p4) target bundleno = 1 (0x1), region = 87 }

</bundles_post_ra>
